<compile_context>
chip_gen: v6e
topology: v6e:2x2x1
jax: 0.10.0
libtpu: 0.0.40
codegen_flags: <defaults>
</compile_context>

<pallas_src>
import math
import jax
import jax.numpy as jnp
from jax.experimental import pallas as pl
from jax.experimental.pallas import tpu as pltpu

F32 = jnp.float32
BF16 = jnp.bfloat16


# ----------------------------- in-kernel helpers -----------------------------

def _layernorm(x, g, b, eps=1e-12):
    # TF-style layernorm (epsilon inside the sqrt), biased variance, fp32 stats.
    u = jnp.mean(x, axis=-1, keepdims=True)
    s = jnp.mean((x - u) ** 2, axis=-1, keepdims=True)
    return g * ((x - u) * jax.lax.rsqrt(s + eps)) + b


def _gelu(x):
    # HuggingFace erf-based gelu (kept exact to match the module).
    return x * 0.5 * (1.0 + jax.lax.erf(x / math.sqrt(2.0)))


# ------------------------------- Pallas kernels ------------------------------

def embed_kernel(e_ref, pos_ref, seg_ref, w2_ref, b2_ref, g_ref, be_ref, o_ref):
    # e_ref: (1, S, E) gathered token embedding; pos/seg: (1, S, D)
    e = e_ref[0].astype(BF16)                                      # (S, E) bf16
    h = jnp.dot(e, w2_ref[...], preferred_element_type=F32) + b2_ref[...]
    h = h + pos_ref[0] + seg_ref[0]
    o_ref[0] = _layernorm(h, g_ref[...], be_ref[...])


def make_block_kernel(n_heads):
    def kernel(x_ref, bias_ref,
               wq_ref, bq_ref, wk_ref, bk_ref, wv_ref, bv_ref,
               wp_ref, bp_ref, g1_ref, be1_ref,
               w1_ref, b1_ref, w2_ref, b2_ref, g2_ref, be2_ref,
               o_ref):
        layer = pl.program_id(1)

        # The output block index only depends on the batch grid axis, so o_ref is
        # VMEM-resident across the (sequential, "arbitrary") layer axis: it carries
        # the activations from layer to layer without touching HBM.
        @pl.when(layer == 0)
        def _():
            o_ref[...] = x_ref[...]

        h = o_ref[0]                                               # (S, D) fp32
        S, D = h.shape
        H = n_heads
        W = D // H
        scale = 1.0 / math.sqrt(W)

        # ---- QKV projections: full (S,D)@(D,D) bf16 matmuls, fp32 accumulation.
        hb = h.astype(BF16)
        q = jnp.dot(hb, wq_ref[...], preferred_element_type=F32) + bq_ref[...]
        k = jnp.dot(hb, wk_ref[...], preferred_element_type=F32) + bk_ref[...]
        v = jnp.dot(hb, wv_ref[...], preferred_element_type=F32) + bv_ref[...]
        q = q * scale                      # fold 1/sqrt(W) into q once (not per head)

        # ---- split heads once: (S, D) -> (H, S, W) (static lane slices, major-axis concat)
        def split_heads(t):
            return jnp.concatenate(
                [t[None, :, i * W:(i + 1) * W] for i in range(H)], axis=0)

        qh, kh, vh = split_heads(q), split_heads(k), split_heads(v)

        # ---- one batched attention over all heads (leading-batch einsums on the MXU)
        s = jnp.einsum('hsw,htw->hst', qh.astype(BF16), kh.astype(BF16),
                       preferred_element_type=F32)                 # (H, S, S) fp32
        s = s + bias_ref[0]                # additive mask bias, broadcast over heads/queries
        s = s - jnp.max(s, axis=-1, keepdims=True)
        p = jnp.exp(s)
        p = p * pl.reciprocal(jnp.sum(p, axis=-1, keepdims=True), approx=True)
        ctx = jnp.einsum('hst,htw->hsw', p.astype(BF16), vh.astype(BF16),
                         preferred_element_type=F32)               # (H, S, W) fp32

        # merge heads back to (S, D)
        attn = jnp.concatenate([ctx[i] for i in range(H)], axis=-1)

        # ---- h = norm1(attn + proj(attn))   (matches the module: h was reassigned to attn)
        proj = jnp.dot(attn.astype(BF16), wp_ref[...],
                       preferred_element_type=F32) + bp_ref[...]
        h1 = _layernorm(attn + proj, g1_ref[...], be1_ref[...])

        # ---- h = norm2(h + pwff(h))
        ff = jnp.dot(h1.astype(BF16), w1_ref[...],
                     preferred_element_type=F32) + b1_ref[...]
        ff = _gelu(ff)
        ff = jnp.dot(ff.astype(BF16), w2_ref[...],
                     preferred_element_type=F32) + b2_ref[...]
        o_ref[0] = _layernorm(h1 + ff, g2_ref[...], be2_ref[...])
    return kernel


# ------------------------------- JAX wrappers --------------------------------

def transformer_forward(p, x_ids, seg_ids, mask, n_layers, n_heads):
    B, S = x_ids.shape
    E = p["tok1"].shape[1]
    D = p["pos"].shape[1]
    Dff = p["fc1_w"].shape[1]

    # Embedding gathers are data-dependent -> plain-JAX glue; the matmul + add +
    # layernorm run in a Pallas kernel (grid over batch).
    e = jnp.take(p["tok1"], x_ids, axis=0)                         # (B, S, E)
    pos_e = p["pos"][:S][None]                                     # (1, S, D)
    seg_e = jnp.take(p["seg"], seg_ids, axis=0)                    # (B, S, D)

    h0 = pl.pallas_call(
        embed_kernel,
        out_shape=jax.ShapeDtypeStruct((B, S, D), F32),
        grid=(B,),
        in_specs=[
            pl.BlockSpec((1, S, E), lambda b: (b, 0, 0)),
            pl.BlockSpec((1, S, D), lambda b: (0, 0, 0)),
            pl.BlockSpec((1, S, D), lambda b: (b, 0, 0)),
            pl.BlockSpec((E, D), lambda b: (0, 0)),
            pl.BlockSpec((1, D), lambda b: (0, 0)),
            pl.BlockSpec((1, D), lambda b: (0, 0)),
            pl.BlockSpec((1, D), lambda b: (0, 0)),
        ],
        out_specs=pl.BlockSpec((1, S, D), lambda b: (b, 0, 0)),
        compiler_params=pltpu.CompilerParams(
            dimension_semantics=("parallel",),
            vmem_limit_bytes=32 * 1024 * 1024),
    )(e, pos_e, seg_e, p["tok2_w"].astype(BF16), p["tok2_b"],
      p["norm0_g"], p["norm0_b"])

    if n_layers == 0:
        return h0

    # Additive mask bias computed ONCE (hoisted out of the kernel / head loop).
    bias = (-10000.0 * (1.0 - mask.astype(F32))).reshape(B, 1, S)

    act = lambda b, l: (b, 0, 0)     # activations / mask: fetched once per batch item
    w2d = lambda b, l: (0, 0)        # tied weights: constant index -> DMA'd once

    # All n_layers weight-tied blocks in a single pallas_call:
    # grid = (batch [parallel -> megacore], layer [arbitrary, sequential]).
    out = pl.pallas_call(
        make_block_kernel(n_heads),
        out_shape=jax.ShapeDtypeStruct((B, S, D), F32),
        grid=(B, n_layers),
        in_specs=[
            pl.BlockSpec((1, S, D), act),                              # embedding output
            pl.BlockSpec((1, 1, S), act),                              # mask bias
            pl.BlockSpec((D, D), w2d), pl.BlockSpec((1, D), w2d),      # q
            pl.BlockSpec((D, D), w2d), pl.BlockSpec((1, D), w2d),      # k
            pl.BlockSpec((D, D), w2d), pl.BlockSpec((1, D), w2d),      # v
            pl.BlockSpec((D, D), w2d), pl.BlockSpec((1, D), w2d),      # proj
            pl.BlockSpec((1, D), w2d), pl.BlockSpec((1, D), w2d),      # norm1
            pl.BlockSpec((D, Dff), w2d), pl.BlockSpec((1, Dff), w2d),  # fc1
            pl.BlockSpec((Dff, D), w2d), pl.BlockSpec((1, D), w2d),    # fc2
            pl.BlockSpec((1, D), w2d), pl.BlockSpec((1, D), w2d),      # norm2
        ],
        out_specs=pl.BlockSpec((1, S, D), act),
        compiler_params=pltpu.CompilerParams(
            dimension_semantics=("parallel", "arbitrary"),
            vmem_limit_bytes=32 * 1024 * 1024),
    )(h0, bias,
      p["q_w"].astype(BF16), p["q_b"], p["k_w"].astype(BF16), p["k_b"],
      p["v_w"].astype(BF16), p["v_b"],
      p["proj_w"].astype(BF16), p["proj_b"], p["norm1_g"], p["norm1_b"],
      p["fc1_w"].astype(BF16), p["fc1_b"], p["fc2_w"].astype(BF16), p["fc2_b"],
      p["norm2_g"], p["norm2_b"])
    return out


# --------------------------- pure-JAX fp32 reference ---------------------------

def _ref_layernorm(x, g, b, eps=1e-12):
    u = jnp.mean(x, axis=-1, keepdims=True)
    s = jnp.mean((x - u) ** 2, axis=-1, keepdims=True)
    return g * ((x - u) / jnp.sqrt(s + eps)) + b


def reference_forward(p, x_ids, seg_ids, mask, n_layers, n_heads):
    B, S = x_ids.shape
    D = p["pos"].shape[1]
    W = D // n_heads
    e = jnp.take(p["tok1"], x_ids, axis=0)
    e = e @ p["tok2_w"] + p["tok2_b"]
    e = e + p["pos"][:S][None] + jnp.take(p["seg"], seg_ids, axis=0)
    h = _ref_layernorm(e, p["norm0_g"], p["norm0_b"])
    for _ in range(n_layers):
        q = (h @ p["q_w"] + p["q_b"]).reshape(B, S, n_heads, W).transpose(0, 2, 1, 3)
        k = (h @ p["k_w"] + p["k_b"]).reshape(B, S, n_heads, W).transpose(0, 2, 1, 3)
        v = (h @ p["v_w"] + p["v_b"]).reshape(B, S, n_heads, W).transpose(0, 2, 1, 3)
        scores = jnp.einsum("bhsw,bhtw->bhst", q, k) / math.sqrt(W)
        scores = scores - 10000.0 * (1.0 - mask[:, None, None, :].astype(F32))
        scores = jax.nn.softmax(scores, axis=-1)
        attn = jnp.einsum("bhst,bhtw->bhsw", scores, v).transpose(0, 2, 1, 3).reshape(B, S, D)
        h = _ref_layernorm(attn + (attn @ p["proj_w"] + p["proj_b"]),
                           p["norm1_g"], p["norm1_b"])
        ff = h @ p["fc1_w"] + p["fc1_b"]
        ff = ff * 0.5 * (1.0 + jax.lax.erf(ff / math.sqrt(2.0)))
        ff = ff @ p["fc2_w"] + p["fc2_b"]
        h = _ref_layernorm(h + ff, p["norm2_g"], p["norm2_b"])
    return h


# ----------------------------------- main -------------------------------------

def init_params(key, vocab_size, embedding, hidden, hidden_ff, max_len, n_segments):
    keys = jax.random.split(key, 16)
    # 0.1 init keeps pre-LayerNorm variance O(1) so the bf16-vs-fp32 comparison is
    # well conditioned (LayerNorm does not amplify the quantization noise).
    n = lambda k, shp: (0.1 * jax.random.normal(k, shp)).astype(F32)
    return {
        "tok1": n(keys[0], (vocab_size, embedding)),
        "tok2_w": n(keys[1], (embedding, hidden)), "tok2_b": n(keys[2], (1, hidden)),
        "pos": n(keys[3], (max_len, hidden)),
        "seg": n(keys[4], (n_segments, hidden)),
        "norm0_g": jnp.ones((1, hidden), F32), "norm0_b": jnp.zeros((1, hidden), F32),
        "q_w": n(keys[5], (hidden, hidden)), "q_b": n(keys[6], (1, hidden)),
        "k_w": n(keys[7], (hidden, hidden)), "k_b": n(keys[8], (1, hidden)),
        "v_w": n(keys[9], (hidden, hidden)), "v_b": n(keys[10], (1, hidden)),
        "proj_w": n(keys[11], (hidden, hidden)), "proj_b": n(keys[12], (1, hidden)),
        "norm1_g": jnp.ones((1, hidden), F32), "norm1_b": jnp.zeros((1, hidden), F32),
        "fc1_w": n(keys[13], (hidden, hidden_ff)), "fc1_b": n(keys[14], (1, hidden_ff)),
        "fc2_w": n(keys[15], (hidden_ff, hidden)), "fc2_b": jnp.zeros((1, hidden), F32),
        "norm2_g": jnp.ones((1, hidden), F32), "norm2_b": jnp.zeros((1, hidden), F32),
    }


if __name__ == "__main__":
    # Small config consistent with the module's forward.
    B, S = 2, 8
    vocab_size, embedding, hidden, hidden_ff = 32, 16, 32, 64
    max_len, n_segments, n_heads, n_layers = 16, 2, 4, 2

    key = jax.random.PRNGKey(0)
    kp, kx, ks = jax.random.split(key, 3)
    params = init_params(kp, vocab_size, embedding, hidden, hidden_ff, max_len, n_segments)

    x_ids = jax.random.randint(kx, (B, S), 0, vocab_size, dtype=jnp.int32)
    seg_ids = jax.random.randint(ks, (B, S), 0, n_segments, dtype=jnp.int32)
    mask = jnp.ones((B, S), F32).at[1, 6:].set(0.0)   # pad out tail of batch item 1

    out = transformer_forward(params, x_ids, seg_ids, mask, n_layers, n_heads)
    out = jax.block_until_ready(out)

    ref = reference_forward(params, x_ids, seg_ids, mask, n_layers, n_heads)
    assert out.shape == (B, S, hidden)
    # Tolerance accounts for bf16 matmul inputs + EUP approx reciprocal in the kernel
    # vs. the pure-fp32 reference; structural bugs would produce O(1) errors.
    assert jnp.allclose(out, ref, atol=5e-2, rtol=5e-2), "Pallas output mismatch vs reference"

    print("KERNEL_OK")
</pallas_src>

<mosaic_0001>
module attributes {stable_mosaic.version = 11 : i64} {
  func.func @embed_kernel(%arg0: i32, %arg1: memref<1x8x16xf32, #tpu.memory_space<vmem>>, %arg2: memref<1x8x32xf32, #tpu.memory_space<vmem>>, %arg3: memref<1x8x32xf32, #tpu.memory_space<vmem>>, %arg4: memref<16x32xbf16, #tpu.memory_space<vmem>>, %arg5: memref<1x32xf32, #tpu.memory_space<vmem>>, %arg6: memref<1x32xf32, #tpu.memory_space<vmem>>, %arg7: memref<1x32xf32, #tpu.memory_space<vmem>>, %arg8: memref<1x8x32xf32, #tpu.memory_space<vmem>>) attributes {dimension_semantics = [#tpu.dimension_semantics<parallel>], iteration_bounds = array<i64: 2>, scalar_prefetch = 0 : i64, scratch_operands = 0 : i64, tpu.core_type = #tpu.core_type<tc>, window_params = [{transform_indices = @transform_0, window_bounds = array<i64: 1, 8, 16>}, {pipeline_mode = #tpu.pipeline_mode<synchronous>, transform_indices = @transform_1, window_bounds = array<i64: 1, 8, 32>}, {transform_indices = @transform_2, window_bounds = array<i64: 1, 8, 32>}, {pipeline_mode = #tpu.pipeline_mode<synchronous>, transform_indices = @transform_3, window_bounds = array<i64: 16, 32>}, {pipeline_mode = #tpu.pipeline_mode<synchronous>, transform_indices = @transform_4, window_bounds = array<i64: 1, 32>}, {pipeline_mode = #tpu.pipeline_mode<synchronous>, transform_indices = @transform_5, window_bounds = array<i64: 1, 32>}, {pipeline_mode = #tpu.pipeline_mode<synchronous>, transform_indices = @transform_6, window_bounds = array<i64: 1, 32>}, {transform_indices = @transform_7, window_bounds = array<i64: 1, 8, 32>}]} {
    %c0 = arith.constant 0 : index
    %c0_0 = arith.constant 0 : index
    %c0_1 = arith.constant 0 : index
    %0 = vector.load %arg1[%c0, %c0_0, %c0_1] : memref<1x8x16xf32, #tpu.memory_space<vmem>>, vector<1x8x16xf32>
    %1 = vector.shape_cast %0 : vector<1x8x16xf32> to vector<8x16xf32>
    %2 = arith.truncf %1 : vector<8x16xf32> to vector<8x16xbf16>
    %c0_2 = arith.constant 0 : index
    %c0_3 = arith.constant 0 : index
    %3 = vector.load %arg4[%c0_2, %c0_3] : memref<16x32xbf16, #tpu.memory_space<vmem>>, vector<16x32xbf16>
    %cst = arith.constant dense<0.000000e+00> : vector<8x32xf32>
    %4 = tpu.matmul %2, %3, %cst {dimension_numbers = #tpu.dot_dimension_numbers<[1], [0], [0], [1], [0, 0, 1, 1], [], []>} : vector<8x16xbf16>, vector<16x32xbf16>, vector<8x32xf32> -> vector<8x32xf32>
    %c0_4 = arith.constant 0 : index
    %c0_5 = arith.constant 0 : index
    %5 = vector.load %arg5[%c0_4, %c0_5] : memref<1x32xf32, #tpu.memory_space<vmem>>, vector<1x32xf32>
    %6 = vector.broadcast %5 : vector<1x32xf32> to vector<8x32xf32>
    %7 = arith.addf %4, %6 : vector<8x32xf32>
    %c0_6 = arith.constant 0 : index
    %c0_7 = arith.constant 0 : index
    %c0_8 = arith.constant 0 : index
    %8 = vector.load %arg2[%c0_6, %c0_7, %c0_8] : memref<1x8x32xf32, #tpu.memory_space<vmem>>, vector<1x8x32xf32>
    %9 = vector.shape_cast %8 : vector<1x8x32xf32> to vector<8x32xf32>
    %10 = arith.addf %7, %9 : vector<8x32xf32>
    %c0_9 = arith.constant 0 : index
    %c0_10 = arith.constant 0 : index
    %c0_11 = arith.constant 0 : index
    %11 = vector.load %arg3[%c0_9, %c0_10, %c0_11] : memref<1x8x32xf32, #tpu.memory_space<vmem>>, vector<1x8x32xf32>
    %12 = vector.shape_cast %11 : vector<1x8x32xf32> to vector<8x32xf32>
    %13 = arith.addf %10, %12 : vector<8x32xf32>
    %c0_12 = arith.constant 0 : index
    %c0_13 = arith.constant 0 : index
    %14 = vector.load %arg6[%c0_12, %c0_13] : memref<1x32xf32, #tpu.memory_space<vmem>>, vector<1x32xf32>
    %c0_14 = arith.constant 0 : index
    %c0_15 = arith.constant 0 : index
    %15 = vector.load %arg7[%c0_14, %c0_15] : memref<1x32xf32, #tpu.memory_space<vmem>>, vector<1x32xf32>
    %cst_16 = arith.constant dense<0.000000e+00> : vector<8xf32>
    %16 = vector.multi_reduction <add>, %13, %cst_16 [1] : vector<8x32xf32> to vector<8xf32>
    %17 = vector.shape_cast %16 : vector<8xf32> to vector<8x1xf32>
    %cst_17 = arith.constant 3.200000e+01 : f32
    %18 = vector.broadcast %cst_17 : f32 to vector<8x1xf32>
    %19 = arith.divf %17, %18 : vector<8x1xf32>
    %20 = vector.broadcast %19 : vector<8x1xf32> to vector<8x32xf32>
    %21 = arith.subf %13, %20 : vector<8x32xf32>
    %22 = arith.mulf %21, %21 : vector<8x32xf32>
    %cst_18 = arith.constant dense<0.000000e+00> : vector<8xf32>
    %23 = vector.multi_reduction <add>, %22, %cst_18 [1] : vector<8x32xf32> to vector<8xf32>
    %24 = vector.shape_cast %23 : vector<8xf32> to vector<8x1xf32>
    %cst_19 = arith.constant 3.200000e+01 : f32
    %25 = vector.broadcast %cst_19 : f32 to vector<8x1xf32>
    %26 = arith.divf %24, %25 : vector<8x1xf32>
    %27 = vector.broadcast %19 : vector<8x1xf32> to vector<8x32xf32>
    %28 = arith.subf %13, %27 : vector<8x32xf32>
    %cst_20 = arith.constant 9.99999996E-13 : f32
    %29 = vector.broadcast %cst_20 : f32 to vector<8x1xf32>
    %30 = arith.addf %26, %29 : vector<8x1xf32>
    %31 = math.rsqrt %30 : vector<8x1xf32>
    %32 = vector.broadcast %31 : vector<8x1xf32> to vector<8x32xf32>
    %33 = arith.mulf %28, %32 : vector<8x32xf32>
    %34 = vector.broadcast %14 : vector<1x32xf32> to vector<8x32xf32>
    %35 = arith.mulf %34, %33 : vector<8x32xf32>
    %36 = vector.broadcast %15 : vector<1x32xf32> to vector<8x32xf32>
    %37 = arith.addf %35, %36 : vector<8x32xf32>
    %c0_21 = arith.constant 0 : index
    %c0_22 = arith.constant 0 : index
    %c0_23 = arith.constant 0 : index
    %38 = vector.load %arg8[%c0_21, %c0_22, %c0_23] : memref<1x8x32xf32, #tpu.memory_space<vmem>>, vector<1x8x32xf32>
    %39 = vector.shape_cast %38 : vector<1x8x32xf32> to vector<8x32xf32>
    %40 = vector.shape_cast %37 : vector<8x32xf32> to vector<1x8x32xf32>
    tpu.vector_store %arg8[%c0_21, %c0_22, %c0_23], %40 {strides = array<i32>} : memref<1x8x32xf32, #tpu.memory_space<vmem>>, vector<1x8x32xf32>,
    return
  }
  func.func @transform_0(%arg0: i32) -> (i32, i32, i32) {
    %c0_i32 = arith.constant 0 : i32
    %c0_i32_0 = arith.constant 0 : i32
    %c0_i32_1 = arith.constant 0 : i32
    return %arg0, %c0_i32, %c0_i32_0 : i32, i32, i32
  }
  func.func @transform_1(%arg0: i32) -> (i32, i32, i32) {
    %c0_i32 = arith.constant 0 : i32
    %c0_i32_0 = arith.constant 0 : i32
    %c0_i32_1 = arith.constant 0 : i32
    %c0_i32_2 = arith.constant 0 : i32
    return %c0_i32, %c0_i32_0, %c0_i32_1 : i32, i32, i32
  }
  func.func @transform_2(%arg0: i32) -> (i32, i32, i32) {
    %c0_i32 = arith.constant 0 : i32
    %c0_i32_0 = arith.constant 0 : i32
    %c0_i32_1 = arith.constant 0 : i32
    return %arg0, %c0_i32, %c0_i32_0 : i32, i32, i32
  }
  func.func @transform_3(%arg0: i32) -> (i32, i32) {
    %c0_i32 = arith.constant 0 : i32
    %c0_i32_0 = arith.constant 0 : i32
    %c0_i32_1 = arith.constant 0 : i32
    return %c0_i32, %c0_i32_0 : i32, i32
  }
  func.func @transform_4(%arg0: i32) -> (i32, i32) {
    %c0_i32 = arith.constant 0 : i32
    %c0_i32_0 = arith.constant 0 : i32
    %c0_i32_1 = arith.constant 0 : i32
    return %c0_i32, %c0_i32_0 : i32, i32
  }
  func.func @transform_5(%arg0: i32) -> (i32, i32) {
    %c0_i32 = arith.constant 0 : i32
    %c0_i32_0 = arith.constant 0 : i32
    %c0_i32_1 = arith.constant 0 : i32
    return %c0_i32, %c0_i32_0 : i32, i32
  }
  func.func @transform_6(%arg0: i32) -> (i32, i32) {
    %c0_i32 = arith.constant 0 : i32
    %c0_i32_0 = arith.constant 0 : i32
    %c0_i32_1 = arith.constant 0 : i32
    return %c0_i32, %c0_i32_0 : i32, i32
  }
  func.func @transform_7(%arg0: i32) -> (i32, i32, i32) {
    %c0_i32 = arith.constant 0 : i32
    %c0_i32_0 = arith.constant 0 : i32
    %c0_i32_1 = arith.constant 0 : i32
    return %arg0, %c0_i32, %c0_i32_0 : i32, i32, i32
  }
}

</mosaic_0001>

<bundles_post_ra>
// kernel: tpu_custom_call.1
= control target key start
LH: loop header
LB: loop body
LE: loop exit
PB: predicated region body
PF: predicated region fallthrough
CT: control target
= control target key end

     0   :  { %s1166_s0 = inlined_call_operand.hbm [shape: f32[2,8,16], index: 0, kind: input, shape index: {}]   ;;  %s1167_s1 = inlined_call_operand.hbm [shape: f32[1,8,32], index: 1, kind: input, shape index: {}]   ;;  %s1168_s2 = inlined_call_operand.hbm [shape: f32[2,8,32], index: 2, kind: input, shape index: {}]   ;;  %s1169_s3 = inlined_call_operand.hbm [shape: bf16[16,32], index: 3, kind: input, shape index: {}]   ;;  %s1170_s4 = inlined_call_operand.vmem [shape: f32[1,32], index: 4, kind: input, shape index: {}]   ;;  %s1171_s5 = inlined_call_operand.vmem [shape: f32[1,32], index: 5, kind: input, shape index: {}]   ;;  %s1172_s6 = inlined_call_operand.vmem [shape: f32[1,32], index: 6, kind: input, shape index: {}]   ;;  %s1173_s7 = inlined_call_operand.hbm [shape: f32[2,8,32], index: 7, kind: output, shape index: {}]  }
   0x1   :  { %1186 = sst [smem:[#allocation19_spill]] %s1166_s0 }
   0x2   :  { %1187 = sst [smem:[#allocation20_spill]] %s1167_s1 }
   0x3   :  { %12 = vsyncpa [#allocation3], 0 }
   0x4   :  { %14 = vsyncpa [#allocation3 + $0x1], 0 }
   0x5   :  { %15 = vsyncpa [#allocation6], 0 }
   0x6   :  { %16 = vsyncpa [#allocation4], 0 }
   0x7   :  { %18 = vsyncpa [#allocation4 + $0x1], 0  ;;  %s922_s24 = smov 0   ;;  %s924_s25 = smov 0  }
   0x8   :  { %s926_s26 = smov 0   ;;  %s928_s27 = smov 0  }
   0x9 LB: > { %1188 = sst [smem:[#allocation15_spill]] %s867_s26  ;;  %s943_s28 = sadd.s32 4294967295, %s871_s27   ;;  %s871_s27 = sphi %s928_s27, %s1215_s27   ;;  %s867_s26 = sphi %s926_s26, %s1217_s26   ;;  %s863_s25 = sphi %s924_s25, %s1219_s25   ;;  %s859_s24 = sphi %s922_s24, %s1218_s24  }
   0xa   : > { %1189 = sst [smem:[#allocation16_spill]] %s871_s27  ;;  %s576_s29 = sadd.s32 4294967294, %s871_s27  }
   0xb   : > { %p44_p0 = scmp.ne.s32.totalorder %s863_s25, %s859_s24  ;;  %p1174_p1 = scmp.eq.s32.totalorder %s943_s28, 0 }
   0xc   : > { %p205_p3 = scmp.eq.s32.totalorder %s576_s29, 1  ;;  %p577_p5 = scmp.ge.s32.totalorder %s871_s27, 1 }
   0xd   : > { %p952_p4 = por %p1174_p1, %p44_p0  ;;  %p212_p7 = scmp.lt.s32.totalorder %s871_s27, 3 }
   0xe   : > { %p957_p6 = por %p205_p3, %p44_p0  ;;  %s873_s10 = smov [#allocation5]  }
   0xf   : > { %s1190_s30 = scalar_select %p952_p4, 1, 0 }
  0x10   : > { %s1191_s8 = scalar_select %p957_p6, 1, 0 }
  0x11   : > { %p962_p8 = pnand %p577_p5, %p212_p7  ;;  %s225_s11 = sshll.u32 %s873_s10, 4  ;;  %s226_s11 = int_to_ptr.vmem [resolvable:$true] %s225_s11 }
  0x12   : > { %s970_s12 = sadd.s32 1, %s871_s27   ;;  %s31_s16 = sadd.s32 1, %s867_s26 }
  0x13   : > { %s1192_s9 = scalar_select %p962_p8, 1, 0 }
  0x14   : > { %p622_p10 = pneg %p962_p8  ;;  %1193 = sst [smem:[#allocation17_spill]] %s970_s12 }
  0x15   : > { %s28_s14 = ssub.s32 %s871_s27, %s970_s12  ;;  %p38_p13 = scmp.ne.s32.totalorder %s867_s26, %s863_s25 }
  0x16   : > { %p974_p11 = pnand %p622_p10, %p1174_p1  ;;  %p980_p12 = scmp.eq.s32.totalorder %s28_s14, 0 }
  0x17   : > { %s698_s17 = scalar_lea.vmem %s226_s11, 128  ;;  %p706_p10 = scmp.lt.s32.totalorder %s226_s11, %s226_s11 }
  0x18   : > { %s1194_s13 = scalar_select %p974_p11, 1, 0 }
  0x19   : > { %p1176_p0 = pneg %p974_p11  ;;  %p699_p3 = scmp.ne.s32.totalorder %s226_s11, %s698_s17 }
  0x1a   : > { %p707_p9 = scmp.lt.s32.totalorder %s698_s17, %s698_s17 }
  0x1b   : > { %p701_p5 = pnand %p699_p3, %p1176_p0 }
  0x1c   : > { %p708_p1 = por %p707_p9, %p706_p10 }
  0x1d   : > { %p702_p7 = pneg %p701_p5 }
  0x1f   : > { %p709_p2 = pnand %p708_p1, %p702_p7 }
  0x21   : > { %712 = shalt.err (!%p709_p2)
}
  0x22   : > { %s1196_s1 = sld [smem:[#allocation20_spill]]  ;;  %p39_p1 = scmp.eq.s32.totalorder %s871_s27, 0 }
  0x23   : > { %s1000_s20 = scalar_select %p980_p12, %s867_s26, %s31_s16  }
  0x24   : > { %p1198_p2 = scmp.eq.s32.totalorder %s943_s28, 1  ;;  %p642_p3 = scmp.lt.s32.totalorder %s871_s27, 2 }
  0x25   : > { %1197 = sst [smem:[#allocation18_spill]] %s1000_s20  ;;  %s258_s22 = sand.u32 1, %s871_s27  }
  0x26   : > { %p1008_p9 = por %p1198_p2, %p38_p13  ;;  %p40_p5 = por %p39_p1, %p38_p13 }
  0x27   : > { %s260_s23 = sand.u32 1, %s867_s26   ;;  %s1175_s29 = sshll.u32 %s871_s27, 7 }
  0x28   : > { %625 = dma.hbm_to_vmem [thread:$0]  (!%p974_p11), %s1196_s1, 128, %s226_s11, [#allocation6]  }
  0x29   : > { %s1199_s21 = scalar_select %p1008_p9, 1, 0 }
  0x2a   : > { %s1019_s10 = sshll.u32 %s260_s23, 3  ;;  %s1200_s0 = sld [smem:[#allocation19_spill]] }
  0x2b   : > { %p1028_p12 = pnand %p642_p3, %p40_p5  ;;  %s262_s17 = scalar_lea.vmem [#allocation2], %s1019_s10 }
  0x2c   : > { %s269_s18 = sshll.u32 %s262_s17, 4  ;;  %s1033_s19 = scalar_lea.sflag [#allocation3], %s258_s22  ;;  %s270_s18 = int_to_ptr.vmem [resolvable:$true] %s269_s18 }
  0x2d   : > { %p715_p7 = pneg %p1028_p12 }
  0x30   : > { %s1026_s15 = scalar_lea.hbm %s1200_s0, %s1175_s29  ;;  %s718_s29 = scalar_lea.hbm %s1200_s0, 256 }
  0x31   : > { %s713_s23 = scalar_lea.hbm %s1026_s15, 128  ;;  %p719_p2 = scmp.lt.s32.totalorder %s1026_s15, %s1200_s0 }
  0x32   : > { %p714_p13 = scmp.ne.s32.totalorder %s1026_s15, %s713_s23  ;;  %p720_p3 = scmp.lt.s32.totalorder %s718_s29, %s713_s23 }
  0x34   : > { %p716_p10 = pnand %p715_p7, %p714_p13  ;;  %p721_p5 = por %p720_p3, %p719_p2 }
  0x36   : > { %p717_p1 = pneg %p716_p10 }
  0x38   : > { %p722_p0 = pnand %p721_p5, %p717_p1 }
  0x3a   : > { %725 = shalt.err (!%p722_p0)
}
  0x3b   : > { %s726_s22 = scalar_lea.vmem %s270_s18, 128  ;;  %s874_s17 = smov [#allocation2]  }
  0x3c   : > { %p727_p6 = scmp.ne.s32.totalorder %s270_s18, %s726_s22  ;;  %s731_s26 = sshll.u32 %s874_s17, 4  ;;  %s732_s26 = int_to_ptr.vmem [resolvable:$false] %s731_s26 }
  0x3d   : > { %s733_s11 = scalar_lea.vmem %s732_s26, 256  ;;  %p734_p10 = scmp.lt.s32.totalorder %s270_s18, %s732_s26 }
  0x3e   : > { %p729_p9 = pnand %p727_p6, %p715_p7  ;;  %p735_p4 = scmp.lt.s32.totalorder %s733_s11, %s726_s22 }
  0x40   : > { %p730_p13 = pneg %p729_p9  ;;  %p736_p8 = por %p735_p4, %p734_p10 }
  0x42   : > { %p737_p11 = pnand %p736_p8, %p730_p13 }
  0x44   : > { %740 = shalt.err (!%p737_p11)
}
  0x45   : > { %632 = dma.hbm_to_vmem [thread:$0]  (!%p1028_p12), %s1026_s15, 128, %s270_s18, %s1033_s19  }
  0x46   : > { %s1202_s1 = sshll.u32 %s871_s27, 7  ;;  %s875_s14 = smov [#allocation8]  }
  0x47   : > { %s1061_s23 = scalar_lea.hbm %s1168_s2, %s1202_s1  ;;  %s235_s17 = sshll.u32 %s875_s14, 4  ;;  %s236_s17 = int_to_ptr.vmem [resolvable:$true] %s235_s17 }
  0x48   : > { %s752_s26 = scalar_lea.vmem %s236_s17, 128  ;;  %p1203_p6 = scmp.ne.s32.totalorder %s1194_s13, 0 }
  0x49   : > { %p753_p4 = scmp.ne.s32.totalorder %s236_s17, %s752_s26  ;;  %p760_p9 = scmp.lt.s32.totalorder %s236_s17, %s236_s17 }
  0x4a   : > { %p1204_p8 = pneg %p1203_p6  ;;  %p761_p1 = scmp.lt.s32.totalorder %s752_s26, %s752_s26 }
  0x4c   : > { %p755_p11 = pnand %p753_p4, %p1204_p8  ;;  %p762_p2 = por %p761_p1, %p760_p9 }
  0x4e   : > { %p756_p0 = pneg %p755_p11 }
  0x50   : > { %p763_p3 = pnand %p762_p2, %p756_p0 }
  0x52   : > { %766 = shalt.err (!%p763_p3)
}
  0x53   : > { %s876_s15 = smov 64   ;;  %s877_s18 = smov 4  }
  0x54   : > { %628 = dma.hbm_to_vmem [thread:$0]  (!%p1203_p6), %s1169_s3, 128, %s236_s17, [#allocation6], %s876_s15, %s876_s15, %s877_s18  }
  0x55   : > { %s280_s1 = scalar_lea.vmem [#allocation7], %s1019_s10  ;;  %s767_s29 = scalar_lea.hbm %s1061_s23, 128 }
  0x56   : > { %s287_s20 = sshll.u32 %s280_s1, 4  ;;  %p768_p5 = scmp.ne.s32.totalorder %s1061_s23, %s767_s29  ;;  %s288_s20 = int_to_ptr.vmem [resolvable:$true] %s287_s20 }
  0x57   : > { %s772_s0 = scalar_lea.hbm %s1168_s2, 256  ;;  %p773_p4 = scmp.lt.s32.totalorder %s1061_s23, %s1168_s2 }
  0x58   : > { %p770_p13 = pnand %p768_p5, %p715_p7  ;;  %p774_p8 = scmp.lt.s32.totalorder %s772_s0, %s767_s29 }
  0x5a   : > { %p771_p10 = pneg %p770_p13  ;;  %p775_p11 = por %p774_p8, %p773_p4 }
  0x5c   : > { %p776_p6 = pnand %p775_p11, %p771_p10 }
  0x5e   : > { %779 = shalt.err (!%p776_p6)
}
  0x5f   : > { %s780_s13 = scalar_lea.vmem %s288_s20, 128  ;;  %s878_s10 = smov [#allocation7]  }
  0x60   : > { %p781_p0 = scmp.ne.s32.totalorder %s288_s20, %s780_s13  ;;  %s785_s17 = sshll.u32 %s878_s10, 4  ;;  %s786_s17 = int_to_ptr.vmem [resolvable:$false] %s785_s17 }
  0x61   : > { %s787_s15 = scalar_lea.vmem %s786_s17, 256  ;;  %p788_p2 = scmp.lt.s32.totalorder %s288_s20, %s786_s17 }
  0x62   : > { %p783_p9 = pnand %p781_p0, %p715_p7  ;;  %p789_p3 = scmp.lt.s32.totalorder %s787_s15, %s780_s13 }
  0x64   : > { %p784_p1 = pneg %p783_p9  ;;  %p790_p5 = por %p789_p3, %p788_p2 }
  0x66   : > { %p791_p13 = pnand %p790_p5, %p784_p1 }
  0x68   : > { %794 = shalt.err (!%p791_p13)
}
  0x69   : > { %635 = dma.hbm_to_vmem [thread:$0]  (!%p1028_p12), %s1061_s23, 128, %s288_s20, %s1033_s19  }
  0x6a   : > { %p1205_p10 = scmp.ne.s32.totalorder %s1192_s9, 0 }
  0x6b   : > { %s298_s0 = sand.u32 (!%p1205_p10), 1, %s943_s28   ;;  %s300_s27 = sand.u32 (!%p1205_p10), 1, %s863_s25  }
  0x6c   : > { %296 = sbr.rel (%p1205_p10) target bundleno = 648 (0x288), region = 48  ;;  %s1097_s12 = sshll.u32 (!%p1205_p10), %s300_s27, 3 }
  0x6d   : > { %s299_s18 = scalar_lea.sflag (!%p1205_p10), [#allocation3], %s298_s0  ;;  %s302_s22 = scalar_lea.vmem (!%p1205_p10), [#allocation2], %s1097_s12 }
  0x6e   : > { %p1206_p7 = scmp.ne.s32.totalorder (!%p1205_p10), %s1190_s30, 0 }
  0x71   : > { %838 = dma.done.wait (%p1206_p7), %s299_s18, 128  }
  0x72   : > { %840 = vsyncadd (%p1206_p7), %s299_s18, 4294967168  ;;  %p1207_p12 = scmp.eq.s32.totalorder %s943_s28, 0 }
  0x74   : > { %842 = dma.done.wait (%p1207_p12), [#allocation6], 128   ;;  %p1208_p4 = pmov %p1207_p12 }
  0x75   : > { %s315_s9 = scalar_lea.vmem [#allocation7], %s1097_s12 }
  0x76   : > { %844 = vsyncadd (%p1208_p4), [#allocation6], 4294967168 }
  0x77   : > { %846 = dma.done.wait (%p1206_p7), %s299_s18, 128  }
  0x78   : > { %848 = vsyncadd (%p1206_p7), %s299_s18, 4294967168  ;;  %p1209_p8 = pmov %p1208_p4 }
  0x79   : > { %p1210_p11 = pmov %p1208_p4 }
  0x7a   : > { %850 = dma.done.wait (%p1209_p8), [#allocation6], 128  }
  0x7b   : > { %852 = vsyncadd (%p1210_p11), [#allocation6], 4294967168  ;;  %v879_v0 = vmov 0.0   ;;  %vm880_vm0 = vmmov 0   ;;  %v684_v1 = vld [vmem:[#allocation8] sm:$0xff]   ;;  %vm373_vm1 = vcmask 130048  }
  0x7c   : > { %602 = vmatprep.subr.bf16.mxu0 %v879_v0  ;;  %604 = vmatprep.mubr.msk.bf16.mxu0 %vm880_vm0, %v879_v0  ;;  %v356_v2 = vld [vmem:[%s302_s22] sm:$0xff]  ;;  %v417_v6 = vld [vmem:[#allocation5] sm:$0xff]  ;;  %v419_v9 = vld [vmem:[%s315_s9] sm:$0xff]  ;;  %vm423_vm2 = vcmask 261120   ;;  %s597_s20 = sshll.u32 %s943_s28, 7  ;;  %s354_s29 = scalar_lea.vmem [#allocation9], %s1097_s12 }
  0x7d   : > { %603 = vmatpush3.bf16.msra.mxu0 %v684_v1  ;;  %v357_v3 = vpack.c.bf16 %v356_v2, %v356_v2  ;;  %v591_v4 = vld [vmem:[%s1170_s4] ss:$0 sm:$0xff]  ;;  %s467_s14 = sshll.u32 %s354_s29, 4  ;;  %s465_s10 = scalar_lea.hbm %s1173_s7, %s597_s20  ;;  %s468_s14 = int_to_ptr.vmem [resolvable:$true] %s467_s14 }
  0x7e   : > { %v594_v24 = vld [vmem:[%s1171_s5] ss:$0 sm:$0xff]  ;;  %s454_s17 = scalar_lea.sflag [#allocation4], %s300_s27  ;;  %s795_s15 = scalar_lea.vmem %s468_s14, 128 }
  0x7f   : > { %v595_v26 = vld [vmem:[%s1172_s6] ss:$0 sm:$0xff]  ;;  %p796_p6 = scmp.ne.s32.totalorder %s468_s14, %s795_s15  ;;  %p1211_p0 = scmp.ne.s32.totalorder %s1199_s21, 0 }
  0x80   : > { %605 = vmatmul.mubr.msk.bf16.vlgmr.msra.gmra.mxu0 %vm373_vm1, %v357_v3  ;;  %s881_s0 = smov [#allocation9]  }
  0x81   : > { %p797_p9 = pnand %p796_p6, %p1211_p0  ;;  %s799_s28 = sshll.u32 %s881_s0, 4  ;;  %s800_s28 = int_to_ptr.vmem [resolvable:$false] %s799_s28 }
  0x82   : > { %s801_s12 = scalar_lea.vmem %s800_s28, 256  ;;  %p802_p2 = scmp.lt.s32.totalorder %s468_s14, %s800_s28 }
  0x83   : > { %p798_p1 = pneg %p797_p9  ;;  %p803_p3 = scmp.lt.s32.totalorder %s801_s12, %s795_s15 }
  0x85   : > { %p804_p5 = por %p803_p3, %p802_p2 }
  0x87   : > { %p805_p13 = pnand %p804_p5, %p798_p1 }
 0x140   : > { %v411_v5 = vpop.f32.mrf.mxu0 }
 0x141   : > { %v412_v7 = vadd.f32 %v591_v4, %v411_v5 }
 0x142   : > { %v606_v8 = vpop.f32.mrf.mxu0 }
 0x143   : > { %v418_v10 = vadd.f32 %v417_v6, %v412_v7 }
 0x144   : > { %v414_v11 = vpop.f32.mrf.mxu0 }
 0x145   : > { %v420_v12 = vadd.f32 %v419_v9, %v418_v10 }
 0x146   : > { %v607_v13 = vpop.f32.mrf.mxu0 }
 0x147   : > { %v424_v14 = vsel %vm423_vm2, %v420_v12, 0.0 }
 0x148   : > { %425 = vadd.xlane.f32.xlu0 %v424_v14 }
 0x1d1   : > { %v426_v15 = vpop.xlane.xlu0 %425 }
 0x1d2   : > { %v428_v16 = vmul.f32 0.03125, %v426_v15 }
 0x1d4   : > { %v429_v17 = vsub.f32 %v420_v12, %v428_v16 }
 0x1d6   : > { %v430_v18 = vmul.f32 %v429_v17, %v429_v17 }
 0x1d8   : > { %v431_v19 = vsel %vm423_vm2, %v430_v18, 0.0 }
 0x1d9   : > { %432 = vadd.xlane.f32.xlu0 %v431_v19 }
 0x262   : > { %v433_v20 = vpop.xlane.xlu0 %432 }
 0x263   : > { %v434_v21 = vmul.f32 0.03125, %v433_v20 }
 0x265   : > { %v435_v22 = vadd.f32 1e-12, %v434_v21 }
 0x267   : > { %685 = vrsqrt.f32 %v435_v22 }
 0x274   : > { %v686_v23 = vpop.eup %685 }
 0x275   : > { %v437_v25 = vmul.f32 %v686_v23, %v429_v17 }
 0x277   : > { %v444_v27 = vmul.f32 %v594_v24, %v437_v25 }
 0x279   : > { %v451_v28 = vadd.f32 %v595_v26, %v444_v27 }
 0x27b   : > { %452 = vst.msk [vmem:[%s354_s29] sm:$0xff] %vm423_vm2, %v451_v28 }
 0x27c   : > { %808 = shalt.err (!%p805_p13)
}
 0x27d   : > { %s809_s18 = scalar_lea.hbm %s465_s10, 128  ;;  %s813_s9 = scalar_lea.hbm %s1173_s7, 256 }
 0x27e   : > { %p810_p10 = scmp.ne.s32.totalorder %s465_s10, %s809_s18  ;;  %p814_p4 = scmp.lt.s32.totalorder %s465_s10, %s1173_s7 }
 0x27f   : > { %p815_p8 = scmp.lt.s32.totalorder %s813_s9, %s809_s18 }
 0x280   : > { %p811_p7 = pnand %p810_p10, %p1211_p0 }
 0x281   : > { %p816_p11 = por %p815_p8, %p814_p4 }
 0x282   : > { %p812_p12 = pneg %p811_p7 }
 0x284   : > { %p817_p6 = pnand %p816_p11, %p812_p12 }
 0x286   : > { %820 = shalt.err (!%p817_p6)
}
 0x287   : > { %620 = dma.vmem_to_hbm [thread:$0]  (%p1211_p0), %s468_s14, 128, %s465_s10, %s454_s17  }
 0x288 PF: > { %s1212_s30 = sld [smem:[#allocation16_spill]]  ;;  %s479_s23 = sand.u32 1, %s859_s24  }
 0x289   : > { %p1213_p9 = scmp.ne.s32.totalorder %s1191_s8, 0  ;;  %s480_s11 = scalar_lea.sflag [#allocation4], %s479_s23 }
 0x28e   : > { %p1214_p1 = scmp.ge.s32.totalorder %s1212_s30, 2 }
 0x290   : > { %p637_p2 = pnand %p1214_p1, %p1213_p9 }
 0x292   : > { %p638_p3 = pneg %p637_p2 }
 0x294   : > { %854 = dma.done.wait (%p638_p3), %s480_s11, 128  }
 0x295   : > { %856 = vsyncadd (%p638_p3), %s480_s11, 4294967168  ;;  %s1215_s27 = sld [smem:[#allocation17_spill]]  ;;  %s1218_s24 = smov %s863_s25 }
 0x296   : > { %s1216_s1 = sld [smem:[#allocation15_spill]] }
 0x297   : > { %s1217_s26 = sld [smem:[#allocation18_spill]] }
 0x29b   : > { %p21_p5 = scmp.ge.s32.totalorder %s1215_s27, 4  }
 0x29c   : > { %s1219_s25 = smov %s1216_s1 }
 0x29d   :  { %23 = sbr.rel (!%p21_p5) target bundleno = 9 (0x9), region = 112 }
 0x2a2   :  { %485 = vsyncpa [#allocation3], 1 }
 0x2a3   :  { %487 = vsyncpa [#allocation3 + $0x1], 1 }
 0x2a4   :  { %488 = vsyncpa [#allocation6], 1 }
 0x2a5   :  { %489 = vsyncpa [#allocation4], 1 }
 0x2a6   :  { %491 = vsyncpa [#allocation4 + $0x1], 1 }

</bundles_post_ra>
